<compile_context>
chip_gen: v7x
topology: tpu7x:2x2x1
jax: 0.10.0
libtpu: 0.0.40
codegen_flags: <defaults>
</compile_context>

<pallas_src>
import functools

import numpy as np
import jax
import jax.numpy as jnp
from jax import lax
from jax.experimental import pallas as pl
from jax.experimental.pallas import tpu as pltpu

_VMEM_LIMIT = 32 * 1024 * 1024


def _round_up(v, m):
    return ((v + m - 1) // m) * m


def _pick_tm(M):
    """Row tile: big tiles to amortize per-step overhead, >=2 tiles when possible."""
    if M % 8 != 0:
        return M                      # small irregular M -> one full-dim block
    if M > 1024:
        return 512
    if M >= 256 and (M // 2) % 8 == 0:
        return M // 2                 # keep both TensorCores busy on v7x
    return M


def _act(y, act):
    if act == "relu":
        return jnp.maximum(y, 0.0)
    if act == "gelu":
        # TODO(synk): PyTorch nn.GELU default is exact erf; tanh approx used here.
        return jax.nn.gelu(y, approximate=True)
    return y


# ----------------------------------------------------------------------------
# Fused matmul (+ optional LayerNorm prologue, + scale/bias, + activation)
# ----------------------------------------------------------------------------
def _mm_kernel(x_ref, w_ref, s_ref, b_ref, o_ref, *, act):
    y = jnp.dot(x_ref[...], w_ref[...], preferred_element_type=jnp.float32)
    y = y * s_ref[...] + b_ref[...]
    o_ref[...] = _act(y, act)


def _mm_ln_kernel(x_ref, g_ref, gb_ref, w_ref, s_ref, b_ref, o_ref, *, act):
    x = x_ref[...].astype(jnp.float32)
    mu = jnp.mean(x, axis=-1, keepdims=True)
    xc = x - mu
    var = jnp.mean(xc * xc, axis=-1, keepdims=True)
    xn = xc * lax.rsqrt(var + 1e-5) * g_ref[...] + gb_ref[...]
    y = jnp.dot(xn.astype(jnp.bfloat16), w_ref[...],
                preferred_element_type=jnp.float32)
    y = y * s_ref[...] + b_ref[...]
    o_ref[...] = _act(y, act)


def matmul_affine(x, w, scale, bias, act="none", ln=None):
    """act((LN?(x) @ w) * scale + bias).  x:(M,K) w:(K,N) scale,bias:(N,)."""
    M, K = x.shape
    N = w.shape[1]
    tm = _pick_tm(M)
    grid = (pl.cdiv(M, tm),)
    wb = w.astype(jnp.bfloat16)
    s2 = scale.reshape(1, N).astype(jnp.float32)
    b2 = bias.reshape(1, N).astype(jnp.float32)
    xb = x.astype(jnp.bfloat16)

    if ln is None:
        kern = functools.partial(_mm_kernel, act=act)
        ins = (xb, wb, s2, b2)
        in_specs = [
            pl.BlockSpec((tm, K), lambda i: (i, 0)),
            pl.BlockSpec((K, N), lambda i: (0, 0)),
            pl.BlockSpec((1, N), lambda i: (0, 0)),
            pl.BlockSpec((1, N), lambda i: (0, 0)),
        ]
    else:
        g, gb = ln
        kern = functools.partial(_mm_ln_kernel, act=act)
        ins = (xb, g.reshape(1, K).astype(jnp.float32),
               gb.reshape(1, K).astype(jnp.float32), wb, s2, b2)
        in_specs = [
            pl.BlockSpec((tm, K), lambda i: (i, 0)),
            pl.BlockSpec((1, K), lambda i: (0, 0)),
            pl.BlockSpec((1, K), lambda i: (0, 0)),
            pl.BlockSpec((K, N), lambda i: (0, 0)),
            pl.BlockSpec((1, N), lambda i: (0, 0)),
            pl.BlockSpec((1, N), lambda i: (0, 0)),
        ]

    return pl.pallas_call(
        kern,
        out_shape=jax.ShapeDtypeStruct((M, N), jnp.float32),
        grid=grid,
        in_specs=in_specs,
        out_specs=pl.BlockSpec((tm, N), lambda i: (i, 0)),
        compiler_params=pltpu.CompilerParams(
            dimension_semantics=("parallel",),
            vmem_limit_bytes=_VMEM_LIMIT),
    )(*ins)


# ----------------------------------------------------------------------------
# Fused conv kernel: in-VMEM patch building (no HBM im2col)
# ----------------------------------------------------------------------------
def _conv_kernel(x_ref, w_ref, s_ref, b_ref, o_ref, *, kh, kw, d, H, W, relu):
    cout = o_ref.shape[-1]
    cin = x_ref.shape[-1]
    acc = jnp.zeros((H * W, cout), jnp.float32)
    for i in range(kh):
        for j in range(kw):
            patch = x_ref[0, i * d:i * d + H, j * d:j * d + W, :]
            patch = patch.reshape(H * W, cin)
            acc = acc + jnp.dot(patch, w_ref[i * kw + j],
                                preferred_element_type=jnp.float32)
    y = acc * s_ref[...] + b_ref[...]
    if relu:
        y = jnp.maximum(y, 0.0)
    o_ref[0] = y.reshape(H, W, cout)


# ----------------------------------------------------------------------------
# Batched matmul / attention kernels
# ----------------------------------------------------------------------------
def _bmm_kernel(a_ref, b_ref, o_ref):
    o_ref[0] = jnp.dot(a_ref[0], b_ref[0], preferred_element_type=jnp.float32)


def pallas_bmm(a, b):
    """(B,M,K) @ (B,K,N) -> (B,M,N)."""
    B, M, K = a.shape
    N = b.shape[2]
    return pl.pallas_call(
        _bmm_kernel,
        out_shape=jax.ShapeDtypeStruct((B, M, N), jnp.float32),
        grid=(B,),
        in_specs=[pl.BlockSpec((1, M, K), lambda i: (i, 0, 0)),
                  pl.BlockSpec((1, K, N), lambda i: (i, 0, 0))],
        out_specs=pl.BlockSpec((1, M, N), lambda i: (i, 0, 0)),
        compiler_params=pltpu.CompilerParams(dimension_semantics=("parallel",)),
    )(a.astype(jnp.bfloat16), b.astype(jnp.bfloat16))


def _attn_kernel(q_ref, k_ref, v_ref, o_ref, *, scale):
    s = jnp.dot(q_ref[0], k_ref[0], preferred_element_type=jnp.float32) * scale
    s = s - jnp.max(s, axis=-1, keepdims=True)
    p = jnp.exp(s)
    denom = jnp.sum(p, axis=-1, keepdims=True)
    o = jnp.dot(p.astype(v_ref.dtype), v_ref[0], preferred_element_type=jnp.float32)
    o_ref[0] = o * pl.reciprocal(denom, approx=True)


def pallas_attn(q, k, v, scale):
    """softmax(scale * q@k, -1) @ v.  q:(B,L,D) k:(B,D,T) v:(B,T,N).  Small L/T."""
    B, L, D = q.shape
    T = k.shape[2]
    N = v.shape[2]
    return pl.pallas_call(
        functools.partial(_attn_kernel, scale=float(scale)),
        out_shape=jax.ShapeDtypeStruct((B, L, N), jnp.float32),
        grid=(B,),
        in_specs=[pl.BlockSpec((1, L, D), lambda i: (i, 0, 0)),
                  pl.BlockSpec((1, D, T), lambda i: (i, 0, 0)),
                  pl.BlockSpec((1, T, N), lambda i: (i, 0, 0))],
        out_specs=pl.BlockSpec((1, L, N), lambda i: (i, 0, 0)),
        compiler_params=pltpu.CompilerParams(dimension_semantics=("parallel",)),
    )(q.astype(jnp.bfloat16), k.astype(jnp.bfloat16), v.astype(jnp.bfloat16))


def _flash_kernel(q_ref, k_ref, v_ref, o_ref, m_sc, l_sc, acc_sc, *, scale):
    kv = pl.program_id(2)

    @pl.when(kv == 0)
    def _():
        m_sc[...] = jnp.full_like(m_sc, -1e30)
        l_sc[...] = jnp.zeros_like(l_sc)
        acc_sc[...] = jnp.zeros_like(acc_sc)

    s = jnp.dot(q_ref[0], k_ref[0], preferred_element_type=jnp.float32) * scale
    m_prev = m_sc[...]
    m_new = jnp.maximum(m_prev, jnp.max(s, axis=-1, keepdims=True))
    alpha = jnp.exp(m_prev - m_new)
    p = jnp.exp(s - m_new)
    l_sc[...] = alpha * l_sc[...] + jnp.sum(p, axis=-1, keepdims=True)
    acc_sc[...] = alpha * acc_sc[...] + jnp.dot(
        p.astype(v_ref.dtype), v_ref[0], preferred_element_type=jnp.float32)
    m_sc[...] = m_new

    @pl.when(kv == pl.num_programs(2) - 1)
    def _():
        o_ref[0] = acc_sc[...] * pl.reciprocal(l_sc[...], approx=True)


def pallas_flash_attn(q, kT, v, scale):
    """Online-softmax attention, KV-tiled.  q:(B,L,D) kT:(B,D,T) v:(B,T,N)."""
    B, L, D = q.shape
    T = kT.shape[2]
    N = v.shape[2]
    # TODO(synk): ragged L/T (not multiple of 128) falls back to a single full tile.
    tq = 128 if L % 128 == 0 else L
    tk = 128 if T % 128 == 0 else T
    grid = (B, L // tq, T // tk)
    return pl.pallas_call(
        functools.partial(_flash_kernel, scale=float(scale)),
        out_shape=jax.ShapeDtypeStruct((B, L, N), jnp.float32),
        grid=grid,
        in_specs=[pl.BlockSpec((1, tq, D), lambda b, qi, ki: (b, qi, 0)),
                  pl.BlockSpec((1, D, tk), lambda b, qi, ki: (b, 0, ki)),
                  pl.BlockSpec((1, tk, N), lambda b, qi, ki: (b, ki, 0))],
        out_specs=pl.BlockSpec((1, tq, N), lambda b, qi, ki: (b, qi, 0)),
        scratch_shapes=[pltpu.VMEM((tq, 1), jnp.float32),
                        pltpu.VMEM((tq, 1), jnp.float32),
                        pltpu.VMEM((tq, N), jnp.float32)],
        compiler_params=pltpu.CompilerParams(
            dimension_semantics=("parallel", "parallel", "arbitrary"),
            vmem_limit_bytes=_VMEM_LIMIT),
    )(q.astype(jnp.bfloat16), kT.astype(jnp.bfloat16), v.astype(jnp.bfloat16))


def _ln_kernel(x_ref, g_ref, b_ref, o_ref):
    x = x_ref[...]
    mu = jnp.mean(x, axis=-1, keepdims=True)
    xc = x - mu
    var = jnp.mean(xc * xc, axis=-1, keepdims=True)
    o_ref[...] = xc * lax.rsqrt(var + 1e-5) * g_ref[...] + b_ref[...]


def pallas_layernorm(x2d, g, b):
    M, D = x2d.shape
    tm = _pick_tm(M)
    return pl.pallas_call(
        _ln_kernel,
        out_shape=jax.ShapeDtypeStruct((M, D), jnp.float32),
        grid=(pl.cdiv(M, tm),),
        in_specs=[pl.BlockSpec((tm, D), lambda i: (i, 0)),
                  pl.BlockSpec((1, D), lambda i: (0, 0)),
                  pl.BlockSpec((1, D), lambda i: (0, 0))],
        out_specs=pl.BlockSpec((tm, D), lambda i: (i, 0)),
        compiler_params=pltpu.CompilerParams(dimension_semantics=("parallel",)),
    )(x2d.astype(jnp.float32), g.reshape(1, D).astype(jnp.float32),
      b.reshape(1, D).astype(jnp.float32))


# ----------------------------------------------------------------------------
# Plain-JAX glue: bilinear resize as interpolation-matrix matmuls, loss
# ----------------------------------------------------------------------------
def _interp_matrix(out_size, in_size, align_corners):
    if align_corners:
        src = jnp.arange(out_size, dtype=jnp.float32) * ((in_size - 1) / max(out_size - 1, 1))
    else:
        src = jnp.maximum((jnp.arange(out_size, dtype=jnp.float32) + 0.5)
                          * (in_size / out_size) - 0.5, 0.0)
    i0 = jnp.minimum(jnp.floor(src).astype(jnp.int32), in_size - 1)
    i1 = jnp.minimum(i0 + 1, in_size - 1)
    w1 = src - i0.astype(jnp.float32)
    w0 = 1.0 - w1
    return (w0[:, None] * jax.nn.one_hot(i0, in_size, dtype=jnp.float32)
            + w1[:, None] * jax.nn.one_hot(i1, in_size, dtype=jnp.float32))


def bilinear(x, size, align_corners):
    B, C, H, W = x.shape
    OH, OW = size
    if (OH, OW) == (H, W):
        return x
    my = _interp_matrix(OH, H, align_corners)          # (OH, H)
    mx = _interp_matrix(OW, W, align_corners)          # (OW, W)
    y = jnp.einsum('oh,bchw->bcow', my, x)
    return jnp.einsum('bcow,pw->bcop', y, mx)


def bce_iou_loss(pred, mask):
    k = 31
    win = lax.reduce_window(mask, 0.0, lax.add, (1, 1, k, 1), (1, 1, 1, 1),
                            [(0, 0), (0, 0), (k // 2, k // 2), (0, 0)])
    win = lax.reduce_window(win, 0.0, lax.add, (1, 1, 1, k), (1, 1, 1, 1),
                            [(0, 0), (0, 0), (0, 0), (k // 2, k // 2)])
    weight = 1.0 + 5.0 * jnp.abs(win / (k * k) - mask)
    bce = jnp.maximum(pred, 0.0) - pred * mask + jnp.log1p(jnp.exp(-jnp.abs(pred)))
    p = jax.nn.sigmoid(pred)
    inter = jnp.sum(p * mask * weight, axis=(2, 3))
    union = jnp.sum((p + mask) * weight, axis=(2, 3))
    wbce = jnp.sum(weight * bce, axis=(2, 3)) / jnp.sum(weight, axis=(2, 3))
    wiou = 1.0 - (inter + 1.0) / (union - inter + 1.0)
    return jnp.mean(wbce + wiou)


# ----------------------------------------------------------------------------
# Deterministic parameter generation
# ----------------------------------------------------------------------------
class ParamGen:
    def __init__(self, seed=0):
        self._key = jax.random.PRNGKey(seed)
        self._n = 0

    def __call__(self, shape, scale=None):
        self._n += 1
        k = jax.random.fold_in(self._key, self._n)
        if scale is None:
            scale = 1.0 / float(np.sqrt(shape[0]))
        return scale * jax.random.normal(k, shape, dtype=jnp.float32)


# ----------------------------------------------------------------------------
# conv = Conv2d + (folded, eval-mode) BatchNorm + optional ReLU
# ----------------------------------------------------------------------------
def make_conv(pg, cin, cout, ks, dilation=1, relu=False, bn=True):
    kh, kw = ks if isinstance(ks, (tuple, list)) else (ks, ks)
    p = dict(w=pg((kh * kw, cin, cout), 1.0 / float(np.sqrt(cin * kh * kw))),
             kh=kh, kw=kw, dil=dilation, relu=relu)
    if bn:
        p["scale"] = 1.0 + 0.1 * pg((cout,), 1.0)
        p["bias"] = 0.1 * pg((cout,), 1.0)
    else:
        p["scale"] = jnp.ones((cout,), jnp.float32)
        p["bias"] = jnp.zeros((cout,), jnp.float32)
    return p


def apply_conv(p, x):
    B, C, H, W = x.shape
    kh, kw, d = p["kh"], p["kw"], p["dil"]
    relu = p["relu"]
    act = "relu" if relu else "none"
    cout = p["w"].shape[-1]

    if kh == 1 and kw == 1:
        x2 = x.transpose(0, 2, 3, 1).reshape(B * H * W, C)
        y = matmul_affine(x2, p["w"][0], p["scale"], p["bias"], act=act)
        return y.reshape(B, H, W, cout).transpose(0, 3, 1, 2)

    ph, pw = ((kh - 1) // 2) * d, ((kw - 1) // 2) * d
    if H % 8 == 0 and W % 8 == 0:
        # TODO(synk): single halo'd spatial block per batch element; at very
        # large resolutions this should additionally tile H with a halo.
        xh = x.transpose(0, 2, 3, 1)                                   # NHWC
        xp = jnp.pad(xh, ((0, 0), (ph, ph), (pw, pw), (0, 0)))
        Hp, Wp = H + 2 * ph, W + 2 * pw
        out = pl.pallas_call(
            functools.partial(_conv_kernel, kh=kh, kw=kw, d=d, H=H, W=W, relu=relu),
            out_shape=jax.ShapeDtypeStruct((B, H, W, cout), jnp.float32),
            grid=(B,),
            in_specs=[pl.BlockSpec((1, Hp, Wp, C), lambda b: (b, 0, 0, 0)),
                      pl.BlockSpec((kh * kw, C, cout), lambda b: (0, 0, 0)),
                      pl.BlockSpec((1, cout), lambda b: (0, 0)),
                      pl.BlockSpec((1, cout), lambda b: (0, 0))],
            out_specs=pl.BlockSpec((1, H, W, cout), lambda b: (b, 0, 0, 0)),
            compiler_params=pltpu.CompilerParams(
                dimension_semantics=("parallel",),
                vmem_limit_bytes=_VMEM_LIMIT),
        )(xp.astype(jnp.bfloat16), p["w"].astype(jnp.bfloat16),
          p["scale"].reshape(1, cout).astype(jnp.float32),
          p["bias"].reshape(1, cout).astype(jnp.float32))
        return out.transpose(0, 3, 1, 2)

    # Tiny spatial maps (4x4, 2x2, ...): im2col traffic is negligible.
    xp = jnp.pad(x, ((0, 0), (0, 0), (ph, ph), (pw, pw)))
    cols = []
    for i in range(kh):
        for j in range(kw):
            cols.append(xp[:, :, i * d:i * d + H, j * d:j * d + W])
    pat = jnp.stack(cols, axis=1)                       # (B, taps, C, H, W)
    pat = pat.transpose(0, 3, 4, 1, 2).reshape(B * H * W, kh * kw * C)
    y = matmul_affine(pat, p["w"].reshape(kh * kw * C, cout),
                      p["scale"], p["bias"], act=act)
    return y.reshape(B, H, W, cout).transpose(0, 3, 1, 2)


def fused_1x1(convs, x, act="none"):
    """Several 1x1 convs sharing input x -> one lane-denser matmul; returns NCHW concat."""
    B, C, H, W = x.shape
    x2 = x.transpose(0, 2, 3, 1).reshape(B * H * W, C)
    w = jnp.concatenate([c["w"][0] for c in convs], axis=1)
    s = jnp.concatenate([c["scale"] for c in convs])
    b = jnp.concatenate([c["bias"] for c in convs])
    y = matmul_affine(x2, w, s, b, act=act)
    return y.reshape(B, H, W, -1).transpose(0, 3, 1, 2)


# ----------------------------------------------------------------------------
# self_attn / PAA_kernel / PAA_e / PAA_d / UACA
# ----------------------------------------------------------------------------
def make_self_attn(pg, c, mode):
    return dict(q=make_conv(pg, c, c // 8, 1), k=make_conv(pg, c, c // 8, 1),
                v=make_conv(pg, c, c, 1), gamma=pg((1,), 0.1), mode=mode)


def apply_dual_self_attn(pH, pW, x):
    """Both H- and W-mode self_attn branches in one fused qkv matmul + one attention call."""
    B, C, H, W = x.shape
    assert H == W  # TODO(synk): non-square maps would need separate branch shapes
    S = H
    c8 = C // 8
    y = fused_1x1([pH["q"], pH["k"], pH["v"], pW["q"], pW["k"], pW["v"]], x)
    parts, o = [], 0
    for n in (c8, c8, C, c8, c8, C):
        parts.append(y[:, o:o + n])
        o += n
    qh, kh, vh, qw, kw_, vw = parts
    # raw .view(B, -1, axis) semantics (axis == S since H == W)
    qh2 = qh.reshape(B, -1, S).transpose(0, 2, 1)
    kh2 = kh.reshape(B, -1, S)
    vh2 = vh.reshape(B, -1, S).transpose(0, 2, 1)
    qw2 = qw.reshape(B, -1, S).transpose(0, 2, 1)
    kw2 = kw_.reshape(B, -1, S)
    vw2 = vw.reshape(B, -1, S).transpose(0, 2, 1)
    q = jnp.concatenate([qh2, qw2], axis=0)
    k = jnp.concatenate([kh2, kw2], axis=0)
    v = jnp.concatenate([vh2, vw2], axis=0)
    oT = pallas_attn(q, k, v, 1.0)                      # (2B, S, C*S)
    oh = oT[:B].transpose(0, 2, 1).reshape(B, C, H, W)
    ow = oT[B:].transpose(0, 2, 1).reshape(B, C, H, W)
    return pH["gamma"] * oh + x, pW["gamma"] * ow + x


def make_paa_kernel(pg, cin, cout, rs):
    return dict(conv0=make_conv(pg, cin, cout, 1),
                conv1=make_conv(pg, cout, cout, (1, rs)),
                conv2=make_conv(pg, cout, cout, (rs, 1)),
                conv3=make_conv(pg, cout, cout, 3, dilation=rs),
                Hattn=make_self_attn(pg, cout, "h"),
                Wattn=make_self_attn(pg, cout, "w"))


def _apply_paa_branch(p, x0):
    """PAA_kernel body, given the (already computed, fused) conv0 output."""
    x = apply_conv(p["conv1"], x0)
    x = apply_conv(p["conv2"], x)
    Hx, Wx = apply_dual_self_attn(p["Hattn"], p["Wattn"], x)
    return apply_conv(p["conv3"], Hx + Wx)


def make_paa_e(pg, cin, cout):
    return dict(b0=make_conv(pg, cin, cout, 1),
                b1=make_paa_kernel(pg, cin, cout, 3),
                b2=make_paa_kernel(pg, cin, cout, 5),
                b3=make_paa_kernel(pg, cin, cout, 7),
                cat=make_conv(pg, 4 * cout, cout, 3),
                res=make_conv(pg, cin, cout, 1))


def apply_paa_e(p, x):
    cout = p["b0"]["w"].shape[-1]
    # Fuse the five 1x1 convs that share input x (b0, b1-3.conv0, res): N = 5*cout.
    y = fused_1x1([p["b0"], p["b1"]["conv0"], p["b2"]["conv0"],
                   p["b3"]["conv0"], p["res"]], x)
    x0 = y[:, 0 * cout:1 * cout]
    xb1 = y[:, 1 * cout:2 * cout]
    xb2 = y[:, 2 * cout:3 * cout]
    xb3 = y[:, 3 * cout:4 * cout]
    xres = y[:, 4 * cout:5 * cout]
    x1 = _apply_paa_branch(p["b1"], xb1)
    x2 = _apply_paa_branch(p["b2"], xb2)
    x3 = _apply_paa_branch(p["b3"], xb3)
    xc = apply_conv(p["cat"], jnp.concatenate([x0, x1, x2, x3], axis=1))
    return jax.nn.relu(xc + xres)


def make_paa_d(pg, ch):
    return dict(conv1=make_conv(pg, ch * 3, ch, 3), conv2=make_conv(pg, ch, ch, 3),
                conv3=make_conv(pg, ch, ch, 3), conv4=make_conv(pg, ch, ch, 3),
                conv5=make_conv(pg, ch, 1, 3, bn=False),
                Hattn=make_self_attn(pg, ch, "h"), Wattn=make_self_attn(pg, ch, "w"))


def apply_paa_d(p, f3, f2, f1):
    size = f1.shape[-2:]
    f3 = bilinear(f3, size, align_corners=True)
    f2 = bilinear(f2, size, align_corners=True)
    f3 = jnp.concatenate([f1, f2, f3], axis=1)
    f3 = apply_conv(p["conv1"], f3)
    Hf3, Wf3 = apply_dual_self_attn(p["Hattn"], p["Wattn"], f3)
    f3 = apply_conv(p["conv2"], Hf3 + Wf3)
    f3 = apply_conv(p["conv3"], f3)
    f3 = apply_conv(p["conv4"], f3)
    out = apply_conv(p["conv5"], f3)
    return f3, out


def make_uaca(pg, cin, ch):
    return dict(ch=ch,
                q1=make_conv(pg, cin, ch, 3, relu=True), q2=make_conv(pg, ch, ch, 3, relu=True),
                k1=make_conv(pg, cin, ch, 1, relu=True), k2=make_conv(pg, ch, ch, 1, relu=True),
                v1=make_conv(pg, cin, ch, 1, relu=True), v2=make_conv(pg, ch, ch, 1, relu=True),
                out1=make_conv(pg, ch, ch, 3, relu=True),
                out2=make_conv(pg, cin + ch, ch, 3, relu=True),
                out3=make_conv(pg, ch, ch, 3, relu=True),
                out4=make_conv(pg, ch, 1, 1))


def apply_uaca(p, x, amap):
    b, c, h, w = x.shape
    ch = p["ch"]
    amap = bilinear(amap, (h, w), align_corners=False)
    fg = jax.nn.sigmoid(amap)
    pp = fg - 0.5
    fg = jnp.clip(pp, 0.0, 1.0)
    bg = jnp.clip(-pp, 0.0, 1.0)
    cg = 0.5 - jnp.abs(pp)
    prob = jnp.concatenate([fg, bg, cg], axis=1)              # (b, 3, h, w)
    f = x.reshape(b, h * w, -1)                               # raw reshape (torch .view)
    prob_r = prob.reshape(b, 3, h * w)
    context = pallas_bmm(prob_r, f)                           # (b, 3, c)
    context = context.transpose(0, 2, 1)[..., None]           # (b, c, 3, 1)
    query = apply_conv(p["q2"], apply_conv(p["q1"], x)).reshape(b, ch, -1).transpose(0, 2, 1)
    key = apply_conv(p["k2"], apply_conv(p["k1"], context)).reshape(b, ch, -1)
    value = apply_conv(p["v2"], apply_conv(p["v1"], context)).reshape(b, ch, -1).transpose(0, 2, 1)
    ctx2 = pallas_attn(query, key, value, scale=ch ** -0.5)   # (b, hw, ch)
    ctx2 = ctx2.transpose(0, 2, 1).reshape(b, -1, h, w)
    ctx2 = apply_conv(p["out1"], ctx2)
    x = jnp.concatenate([x, ctx2], axis=1)
    x = apply_conv(p["out2"], x)
    x = apply_conv(p["out3"], x)
    out = apply_conv(p["out4"], x)
    out = out + amap
    return x, out


# ----------------------------------------------------------------------------
# Simplified SwinB backbone (see TODO(synk) at top)
# ----------------------------------------------------------------------------
def make_backbone(pg, c1, heads=(2, 4, 8, 16)):
    bb = dict(c1=c1,
              patch_w=pg((3 * 4 * 4, c1)),
              patch_b=0.02 * pg((c1,), 1.0),
              patch_ln=(jnp.ones((c1,), jnp.float32), jnp.zeros((c1,), jnp.float32)))
    layers = []
    dim = c1
    for s in range(4):
        C = dim
        blk = dict(nh=heads[s],
                   ln1=(jnp.ones((C,), jnp.float32), jnp.zeros((C,), jnp.float32)),
                   ln2=(jnp.ones((C,), jnp.float32), jnp.zeros((C,), jnp.float32)),
                   qkv_w=pg((C, 3 * C)), qkv_b=0.02 * pg((3 * C,), 1.0),
                   proj_w=pg((C, C)), proj_b=0.02 * pg((C,), 1.0),
                   fc1_w=pg((C, 4 * C)), fc1_b=0.02 * pg((4 * C,), 1.0),
                   fc2_w=pg((4 * C, C)), fc2_b=0.02 * pg((C,), 1.0))
        lp = dict(block=blk)
        if s < 3:
            lp["merge"] = dict(norm=(jnp.ones((4 * C,), jnp.float32),
                                     jnp.zeros((4 * C,), jnp.float32)),
                               w=pg((4 * C, 2 * C)))
            dim = 2 * C
        layers.append(lp)
    bb["layers"] = layers
    return bb


def apply_swin_block(bp, x):
    B, L, C = x.shape
    nh = bp["nh"]
    dh = C // nh
    x2 = x.reshape(B * L, C)
    # LN1 fused as matmul prologue; QKV already one wide matmul.
    qkv = matmul_affine(x2, bp["qkv_w"], jnp.ones((3 * C,), jnp.float32), bp["qkv_b"],
                        ln=bp["ln1"])
    qkv = qkv.reshape(B, L, 3, nh, dh).transpose(2, 0, 3, 1, 4)
    q = qkv[0].reshape(B * nh, L, dh)
    k = qkv[1].reshape(B * nh, L, dh)
    v = qkv[2].reshape(B * nh, L, dh)
    a = pallas_flash_attn(q, k.transpose(0, 2, 1), v, scale=dh ** -0.5)
    a = a.reshape(B, nh, L, dh).transpose(0, 2, 1, 3).reshape(B * L, C)
    a = matmul_affine(a, bp["proj_w"], jnp.ones((C,), jnp.float32), bp["proj_b"])
    x2 = x2 + a
    h = matmul_affine(x2, bp["fc1_w"], jnp.ones((4 * C,), jnp.float32), bp["fc1_b"],
                      act="gelu", ln=bp["ln2"])
    h = matmul_affine(h, bp["fc2_w"], jnp.ones((C,), jnp.float32), bp["fc2_b"])
    x2 = x2 + h
    return x2.reshape(B, L, C)


def apply_patch_merge(mp, x, Hc, Wc):
    B, L, C = x.shape
    xg = x.reshape(B, Hc, Wc, C)
    x0 = xg[:, 0::2, 0::2, :]
    x1 = xg[:, 1::2, 0::2, :]
    x2 = xg[:, 0::2, 1::2, :]
    x3 = xg[:, 1::2, 1::2, :]
    xc = jnp.concatenate([x0, x1, x2, x3], axis=-1).reshape(B * (Hc // 2) * (Wc // 2), 4 * C)
    xc = matmul_affine(xc, mp["w"], jnp.ones((2 * C,), jnp.float32),
                       jnp.zeros((2 * C,), jnp.float32), ln=mp["norm"])
    return xc.reshape(B, (Hc // 2) * (Wc // 2), 2 * C)


def apply_backbone(bb, x):
    B, _, H, W = x.shape
    c1 = bb["c1"]
    Hc, Wc = H // 4, W // 4
    patches = x.reshape(B, 3, Hc, 4, Wc, 4).transpose(0, 2, 4, 1, 3, 5).reshape(B * Hc * Wc, 48)
    t = matmul_affine(patches, bb["patch_w"], jnp.ones((c1,), jnp.float32), bb["patch_b"])
    t = pallas_layernorm(t, bb["patch_ln"][0], bb["patch_ln"][1])
    cur = t.reshape(B, Hc * Wc, c1)
    feats = [cur]                       # x1 = stem(x)
    res = (Hc, Wc)
    for lp in bb["layers"]:
        cur = apply_swin_block(lp["block"], cur)
        if "merge" in lp:
            cur = apply_patch_merge(lp["merge"], cur, res[0], res[1])
            res = (res[0] // 2, res[1] // 2)
        feats.append(cur)
    return feats                        # [x1, x2, x3, x4, x5] in token form


# ----------------------------------------------------------------------------
# UACANet_SwinB forward
# ----------------------------------------------------------------------------
def build_params(channels=32, c1=32):
    pg = ParamGen(0)
    return dict(backbone=make_backbone(pg, c1),
                context2=make_paa_e(pg, 2 * c1, channels),
                context3=make_paa_e(pg, 4 * c1, channels),
                context4=make_paa_e(pg, 8 * c1, channels),
                decoder=make_paa_d(pg, channels),
                attention2=make_uaca(pg, channels * 2, channels),
                attention3=make_uaca(pg, channels * 2, channels),
                attention4=make_uaca(pg, channels * 2, channels))


def uacanet_forward(params, sample):
    x = sample["image"]
    y = sample.get("gt", None)
    B, _, H, W = x.shape

    feats = apply_backbone(params["backbone"], x)
    x1, x2, x3, x4, x5 = feats

    def to_nchw(t, hh, ww):
        return t.reshape(B, hh, ww, -1).transpose(0, 3, 1, 2)

    x1 = to_nchw(x1, H // 4, W // 4)
    x2 = to_nchw(x2, H // 8, W // 8)
    x3 = to_nchw(x3, H // 16, W // 16)
    x4 = to_nchw(x4, H // 32, W // 32)
    x5 = to_nchw(x5, H // 32, W // 32)

    x2 = apply_paa_e(params["context2"], x2)
    x3 = apply_paa_e(params["context3"], x3)
    x4 = apply_paa_e(params["context4"], x4)

    f5, a5 = apply_paa_d(params["decoder"], x4, x3, x2)
    out5 = bilinear(a5, (H, W), align_corners=False)

    f4, a4 = apply_uaca(params["attention4"],
                        jnp.concatenate([x4, bilinear(f5, x4.shape[-2:], False)], axis=1), a5)
    out4 = bilinear(a4, (H, W), align_corners=False)

    f3, a3 = apply_uaca(params["attention3"],
                        jnp.concatenate([x3, bilinear(f4, x3.shape[-2:], False)], axis=1), a4)
    out3 = bilinear(a3, (H, W), align_corners=False)

    _, a2 = apply_uaca(params["attention2"],
                       jnp.concatenate([x2, bilinear(f3, x2.shape[-2:], False)], axis=1), a3)
    out2 = bilinear(a2, (H, W), align_corners=False)

    if y is not None:
        loss = (bce_iou_loss(out2, y) + bce_iou_loss(out3, y)
                + bce_iou_loss(out4, y) + bce_iou_loss(out5, y))
        debug = [out5, out4, out3]
    else:
        loss = 0
        debug = []
    return {"pred": out2, "loss": loss, "debug": debug}


# ----------------------------------------------------------------------------
if __name__ == "__main__":
    key = jax.random.PRNGKey(0)
    kx, kg = jax.random.split(key)
    B, H, W = 2, 64, 64
    image = jax.random.normal(kx, (B, 3, H, W), dtype=jnp.float32)
    gt = (jax.random.uniform(kg, (B, 1, H, W)) > 0.5).astype(jnp.float32)

    params = build_params(channels=32, c1=32)
    out = uacanet_forward(params, {"image": image, "gt": gt})
    jax.block_until_ready((out["pred"], out["loss"]))
    assert out["pred"].shape == (B, 1, H, W)
    print("KERNEL_OK")
</pallas_src>

<mosaic_0001>
module attributes {stable_mosaic.version = 11 : i64} {
  func.func @_mm_kernel(%arg0: i32, %arg1: memref<256x48xbf16, #tpu.memory_space<vmem>>, %arg2: memref<48x32xbf16, #tpu.memory_space<vmem>>, %arg3: memref<1x32xf32, #tpu.memory_space<vmem>>, %arg4: memref<1x32xf32, #tpu.memory_space<vmem>>, %arg5: memref<256x32xf32, #tpu.memory_space<vmem>>) attributes {dimension_semantics = [#tpu.dimension_semantics<parallel>], iteration_bounds = array<i64: 2>, scalar_prefetch = 0 : i64, scratch_operands = 0 : i64, tpu.core_type = #tpu.core_type<tc>, window_params = [{transform_indices = @transform_0, window_bounds = array<i64: 256, 48>}, {pipeline_mode = #tpu.pipeline_mode<synchronous>, transform_indices = @transform_1, window_bounds = array<i64: 48, 32>}, {pipeline_mode = #tpu.pipeline_mode<synchronous>, transform_indices = @transform_2, window_bounds = array<i64: 1, 32>}, {pipeline_mode = #tpu.pipeline_mode<synchronous>, transform_indices = @transform_3, window_bounds = array<i64: 1, 32>}, {transform_indices = @transform_4, window_bounds = array<i64: 256, 32>}]} {
    %c0 = arith.constant 0 : index
    %c0_0 = arith.constant 0 : index
    %0 = vector.load %arg1[%c0, %c0_0] : memref<256x48xbf16, #tpu.memory_space<vmem>>, vector<256x48xbf16>
    %c0_1 = arith.constant 0 : index
    %c0_2 = arith.constant 0 : index
    %1 = vector.load %arg2[%c0_1, %c0_2] : memref<48x32xbf16, #tpu.memory_space<vmem>>, vector<48x32xbf16>
    %cst = arith.constant dense<0.000000e+00> : vector<256x32xf32>
    %2 = tpu.matmul %0, %1, %cst {dimension_numbers = #tpu.dot_dimension_numbers<[1], [0], [0], [1], [0, 0, 1, 1], [], []>} : vector<256x48xbf16>, vector<48x32xbf16>, vector<256x32xf32> -> vector<256x32xf32>
    %c0_3 = arith.constant 0 : index
    %c0_4 = arith.constant 0 : index
    %3 = vector.load %arg3[%c0_3, %c0_4] : memref<1x32xf32, #tpu.memory_space<vmem>>, vector<1x32xf32>
    %4 = vector.broadcast %3 : vector<1x32xf32> to vector<256x32xf32>
    %5 = arith.mulf %2, %4 : vector<256x32xf32>
    %c0_5 = arith.constant 0 : index
    %c0_6 = arith.constant 0 : index
    %6 = vector.load %arg4[%c0_5, %c0_6] : memref<1x32xf32, #tpu.memory_space<vmem>>, vector<1x32xf32>
    %7 = vector.broadcast %6 : vector<1x32xf32> to vector<256x32xf32>
    %8 = arith.addf %5, %7 : vector<256x32xf32>
    %c0_7 = arith.constant 0 : index
    %c0_8 = arith.constant 0 : index
    %9 = vector.load %arg5[%c0_7, %c0_8] : memref<256x32xf32, #tpu.memory_space<vmem>>, vector<256x32xf32>
    tpu.vector_store %arg5[%c0_7, %c0_8], %8 {strides = array<i32>} : memref<256x32xf32, #tpu.memory_space<vmem>>, vector<256x32xf32>,
    return
  }
  func.func @transform_0(%arg0: i32) -> (i32, i32) {
    %c0_i32 = arith.constant 0 : i32
    %c0_i32_0 = arith.constant 0 : i32
    return %arg0, %c0_i32 : i32, i32
  }
  func.func @transform_1(%arg0: i32) -> (i32, i32) {
    %c0_i32 = arith.constant 0 : i32
    %c0_i32_0 = arith.constant 0 : i32
    %c0_i32_1 = arith.constant 0 : i32
    return %c0_i32, %c0_i32_0 : i32, i32
  }
  func.func @transform_2(%arg0: i32) -> (i32, i32) {
    %c0_i32 = arith.constant 0 : i32
    %c0_i32_0 = arith.constant 0 : i32
    %c0_i32_1 = arith.constant 0 : i32
    return %c0_i32, %c0_i32_0 : i32, i32
  }
  func.func @transform_3(%arg0: i32) -> (i32, i32) {
    %c0_i32 = arith.constant 0 : i32
    %c0_i32_0 = arith.constant 0 : i32
    %c0_i32_1 = arith.constant 0 : i32
    return %c0_i32, %c0_i32_0 : i32, i32
  }
  func.func @transform_4(%arg0: i32) -> (i32, i32) {
    %c0_i32 = arith.constant 0 : i32
    %c0_i32_0 = arith.constant 0 : i32
    return %arg0, %c0_i32 : i32, i32
  }
}

</mosaic_0001>

<bundles_post_ra>
// kernel: tpu_custom_call.1
= control target key start
LH: loop header
LB: loop body
LE: loop exit
PB: predicated region body
PF: predicated region fallthrough
CT: control target
= control target key end

     0   :  { %s886_s15 = smov 0   ;;  %s1090_s0 = inlined_call_operand.vmem [shape: bf16[512,48], index: 0, kind: input, shape index: {}]   ;;  %s1091_s1 = inlined_call_operand.vmem [shape: bf16[48,32], index: 1, kind: input, shape index: {}]   ;;  %s1092_s2 = inlined_call_operand.vmem [shape: f32[1,32], index: 2, kind: input, shape index: {}]   ;;  %s1093_s3 = inlined_call_operand.vmem [shape: f32[1,32], index: 3, kind: input, shape index: {}]   ;;  %s1094_s4 = inlined_call_operand.vmem [shape: f32[512,32], index: 4, kind: output, shape index: {}]  }
   0x1 LB: > { %s715_s16 = sadd.s32 4294967295, %s859_s15   ;;  %p719_p0 = scmp.ge.s32.totalorder %s859_s15, 1  ;;  %s859_s15 = sphi %s886_s15, %s14_s15  }
   0x2   : > { %p163_p1 = scmp.lt.s32.totalorder %s859_s15, 3 }
   0x4   : > { %p164_p2 = pnand %p719_p0, %p163_p1 }
   0x5   : > { %v834_v0 = vld [vmem:[%s1091_s1] sm:$0xff] (!%p164_p2)   ;;  %s720_s19 = sshll.u32 (!%p164_p2), %s715_s16, 5  ;;  %v835_v1 = vld [vmem:[%s1091_s1 + $0x8] sm:$0xff] (!%p164_p2)   ;;  %v836_v2 = vld [vmem:[%s1091_s1 + $0x10] sm:$0xff] (!%p164_p2)   ;;  %vm338_vm0 = vcmask (!%p164_p2), 392192   ;;  %vm626_vm1 = vcmask (!%p164_p2), 261120  }
   0x6   : > { %167 = sbr.rel (%p164_p2) target bundleno = 263 (0x107), region = 36  ;;  %p190_p3 = scmp.lt.s32.totalorder (!%p164_p2), %s720_s19, 63  ;;  %782 = vmatprep.subr.bf16.mxu0 (!%p164_p2), %v834_v0  ;;  %820 = vmatprep.subr.bf16.mxu1 (!%p164_p2), %v834_v0  ;;  %v946_v19 = vld [vmem:[%s1092_s2] ss:$0 sm:$0xff] (!%p164_p2) }
   0x7   : > { %783 = vmatpush3.bf16.msra.mxu0 (!%p164_p2), %v834_v0  ;;  %823 = vmatpush3.bf16.msra.mxu1 (!%p164_p2), %v834_v0  ;;  %v952_v21 = vld [vmem:[%s1093_s3] ss:$0 sm:$0xff] (!%p164_p2) }
   0x8   : > { %784 = vmatprep.subr.bf16.mxu0 (!%p164_p2), %v835_v1  ;;  %821 = vmatprep.subr.bf16.mxu1 (!%p164_p2), %v835_v1 }
   0xb   : > { %785 = vmatpush3.bf16.msra.mxu0 (!%p164_p2), %v835_v1  ;;  %824 = vmatpush3.bf16.msra.mxu1 (!%p164_p2), %v835_v1 }
   0xc   : > { %786 = vmatprep.subr.bf16.mxu0 (!%p164_p2), %v836_v2  ;;  %822 = vmatprep.subr.bf16.mxu1 (!%p164_p2), %v836_v2 }
   0xd   : > { %s1096_s19 = smov (!%p190_p3, %s720_s19), 63 }
   0xe   : > { %s721_s24 = sshll.u32 %s1096_s19, 2  ;;  %s723_s30 = sshll.u32 %s1096_s19, 3 }
   0xf   : > { %s909_s27 = scalar_lea.vmem %s1090_s0, %s721_s24  ;;  %787 = vmatpush3.bf16.msra.mxu0 %v836_v2  ;;  %825 = vmatpush3.bf16.msra.mxu1 %v836_v2  ;;  %s959_s9 = scalar_lea.vmem %s1094_s4, %s723_s30 }
  0x10   : > { %v837_v3 = vld [vmem:[%s909_s27] sm:$0xff]   ;;  %v839_v5 = vld [vmem:[%s909_s27 + $0x8] sm:$0xff]   ;;  %v841_v7 = vld [vmem:[%s909_s27 + $0x10] sm:$0xff]  }
  0x11   : > { %v838_v4 = vld [vmem:[%s909_s27 + $0x40] sm:$0xff]   ;;  %788 = vmatprep.mubr.msk.bf16.mxu0 %vm338_vm0, %v837_v3  ;;  %v840_v6 = vld [vmem:[%s909_s27 + $0x48] sm:$0xff]   ;;  %v842_v8 = vld [vmem:[%s909_s27 + $0x50] sm:$0xff]  }
  0x12   : > { %804 = vmatprep.mubr.msk.bf16.mxu1 %vm338_vm0, %v838_v4  ;;  %789 = vmatmul.mubr.msk.bf16.vlgmr.msra.gmra.mrb[0].mxu0 %vm338_vm0, %v839_v5  ;;  %v843_v9 = vld [vmem:[%s909_s27 + $0x18] sm:$0xff]   ;;  %v845_v11 = vld [vmem:[%s909_s27 + $0x20] sm:$0xff]   ;;  %v847_v13 = vld [vmem:[%s909_s27 + $0x28] sm:$0xff]  }
  0x13   : > { %805 = vmatmul.mubr.msk.bf16.vlgmr.msra.gmra.mrb[0].mxu1 %vm338_vm0, %v840_v6  ;;  %792 = vmatprep.mubr.msk.bf16.mxu0 %vm338_vm0, %v841_v7  ;;  %v844_v10 = vld [vmem:[%s909_s27 + $0x58] sm:$0xff]   ;;  %v846_v12 = vld [vmem:[%s909_s27 + $0x60] sm:$0xff]   ;;  %v848_v14 = vld [vmem:[%s909_s27 + $0x68] sm:$0xff]  }
  0x14   : > { %808 = vmatprep.mubr.msk.bf16.mxu1 %vm338_vm0, %v842_v8  ;;  %v849_v15 = vld [vmem:[%s909_s27 + $0x30] sm:$0xff]   ;;  %v851_v17 = vld [vmem:[%s909_s27 + $0x38] sm:$0xff]  }
  0x15   : > { %v850_v16 = vld [vmem:[%s909_s27 + $0x70] sm:$0xff]   ;;  %v852_v18 = vld [vmem:[%s909_s27 + $0x78] sm:$0xff]  }
  0x1a   : > { %793 = vmatmul.mubr.msk.bf16.gmra.mrb[4].mxu0 %vm338_vm0, %v843_v9 }
  0x1b   : > { %809 = vmatmul.mubr.msk.bf16.gmra.mrb[4].mxu1 %vm338_vm0, %v844_v10  ;;  %796 = vmatprep.mubr.msk.bf16.mxu0 %vm338_vm0, %v845_v11 }
  0x1c   : > { %812 = vmatprep.mubr.msk.bf16.mxu1 %vm338_vm0, %v846_v12 }
  0x22   : > { %797 = vmatmul.mubr.msk.bf16.gmra.mrb[8].mxu0 %vm338_vm0, %v847_v13 }
  0x23   : > { %813 = vmatmul.mubr.msk.bf16.gmra.mrb[8].mxu1 %vm338_vm0, %v848_v14  ;;  %800 = vmatprep.mubr.msk.bf16.mxu0 %vm338_vm0, %v849_v15 }
  0x24   : > { %816 = vmatprep.mubr.msk.bf16.mxu1 %vm338_vm0, %v850_v16 }
  0x2a   : > { %801 = vmatmul.mubr.msk.bf16.gmra.mrb[12].mxu0 %vm338_vm0, %v851_v17 }
  0x2b   : > { %817 = vmatmul.mubr.msk.bf16.gmra.mrb[12].mxu1 %vm338_vm0, %v852_v18 }
  0xe5   : > { %v790_v20 = vpop.f32.mrb[0].mxu0 }
  0xe6   : > { %v806_v22 = vpop.f32.mrb[0].mxu1  ;;  %v557_v23 = vmul.f32 %v790_v20, %v946_v19  ;;  %v421_v25 = vpop.f32.mrb[1].mxu0 }
  0xe7   : > { %v573_v24 = vmul.f32 %v806_v22, %v946_v19  ;;  %v485_v26 = vpop.f32.mrb[1].mxu1  ;;  %v555_v27 = vmul.f32 %v946_v19, %v421_v25  ;;  %v791_v29 = vpop.f32.mrb[2].mxu0 }
  0xe8   : > { %v571_v28 = vmul.f32 %v946_v19, %v485_v26  ;;  %v807_v30 = vpop.f32.mrb[2].mxu1  ;;  %v596_v31 = vadd.f32 %v952_v21, %v557_v23  ;;  %v558_v33 = vmul.f32 %v791_v29, %v946_v19  ;;  %v424_v35 = vpop.f32.mrb[3].mxu0 }
  0xe9   : > { %v612_v32 = vadd.f32 %v952_v21, %v573_v24  ;;  %v574_v34 = vmul.f32 %v807_v30, %v946_v19  ;;  %v488_v36 = vpop.f32.mrb[3].mxu1  ;;  %v594_v37 = vadd.f32 %v952_v21, %v555_v27  ;;  %v556_v39 = vmul.f32 %v946_v19, %v424_v35 }
  0xea   : > { %v610_v38 = vadd.f32 %v952_v21, %v571_v28  ;;  %v572_v40 = vmul.f32 %v946_v19, %v488_v36  ;;  %629 = vst.msk [vmem:[%s959_s9 + $0x10] sm:$0xff] %vm626_vm1, %v596_v31  ;;  %v597_v41 = vadd.f32 %v952_v21, %v558_v33 }
  0xeb   : > { %645 = vst.msk [vmem:[%s959_s9 + $0x90] sm:$0xff] %vm626_vm1, %v612_v32  ;;  %v613_v42 = vadd.f32 %v952_v21, %v574_v34  ;;  %627 = vst.msk [vmem:[%s959_s9] sm:$0xff] %vm626_vm1, %v594_v37  ;;  %v595_v43 = vadd.f32 %v952_v21, %v556_v39 }
  0xec   : > { %643 = vst.msk [vmem:[%s959_s9 + $0x80] sm:$0xff] %vm626_vm1, %v610_v38  ;;  %v611_v44 = vadd.f32 %v952_v21, %v572_v40  ;;  %630 = vst.msk [vmem:[%s959_s9 + $0x18] sm:$0xff] %vm626_vm1, %v597_v41 }
  0xed   : > { %646 = vst.msk [vmem:[%s959_s9 + $0x98] sm:$0xff] %vm626_vm1, %v613_v42  ;;  %628 = vst.msk [vmem:[%s959_s9 + $0x8] sm:$0xff] %vm626_vm1, %v595_v43  ;;  %v794_v45 = vpop.f32.mrb[4].mxu0 }
  0xee   : > { %644 = vst.msk [vmem:[%s959_s9 + $0x88] sm:$0xff] %vm626_vm1, %v611_v44  ;;  %v810_v46 = vpop.f32.mrb[4].mxu1  ;;  %v561_v47 = vmul.f32 %v794_v45, %v946_v19  ;;  %v437_v49 = vpop.f32.mrb[5].mxu0 }
  0xef   : > { %v577_v48 = vmul.f32 %v810_v46, %v946_v19  ;;  %v501_v50 = vpop.f32.mrb[5].mxu1  ;;  %v559_v51 = vmul.f32 %v946_v19, %v437_v49  ;;  %v795_v53 = vpop.f32.mrb[6].mxu0 }
  0xf0   : > { %v575_v52 = vmul.f32 %v946_v19, %v501_v50  ;;  %v811_v54 = vpop.f32.mrb[6].mxu1  ;;  %v600_v55 = vadd.f32 %v952_v21, %v561_v47  ;;  %v562_v57 = vmul.f32 %v795_v53, %v946_v19  ;;  %v440_v59 = vpop.f32.mrb[7].mxu0 }
  0xf1   : > { %v616_v56 = vadd.f32 %v952_v21, %v577_v48  ;;  %v578_v58 = vmul.f32 %v811_v54, %v946_v19  ;;  %v504_v60 = vpop.f32.mrb[7].mxu1  ;;  %v598_v61 = vadd.f32 %v952_v21, %v559_v51  ;;  %v560_v63 = vmul.f32 %v946_v19, %v440_v59 }
  0xf2   : > { %v614_v62 = vadd.f32 %v952_v21, %v575_v52  ;;  %v576_v0 = vmul.f32 %v946_v19, %v504_v60  ;;  %633 = vst.msk [vmem:[%s959_s9 + $0x30] sm:$0xff] %vm626_vm1, %v600_v55  ;;  %v601_v1 = vadd.f32 %v952_v21, %v562_v57 }
  0xf3   : > { %649 = vst.msk [vmem:[%s959_s9 + $0xb0] sm:$0xff] %vm626_vm1, %v616_v56  ;;  %v617_v2 = vadd.f32 %v952_v21, %v578_v58  ;;  %631 = vst.msk [vmem:[%s959_s9 + $0x20] sm:$0xff] %vm626_vm1, %v598_v61  ;;  %v599_v3 = vadd.f32 %v952_v21, %v560_v63 }
  0xf4   : > { %647 = vst.msk [vmem:[%s959_s9 + $0xa0] sm:$0xff] %vm626_vm1, %v614_v62  ;;  %v615_v4 = vadd.f32 %v952_v21, %v576_v0  ;;  %634 = vst.msk [vmem:[%s959_s9 + $0x38] sm:$0xff] %vm626_vm1, %v601_v1 }
  0xf5   : > { %650 = vst.msk [vmem:[%s959_s9 + $0xb8] sm:$0xff] %vm626_vm1, %v617_v2  ;;  %632 = vst.msk [vmem:[%s959_s9 + $0x28] sm:$0xff] %vm626_vm1, %v599_v3  ;;  %v798_v5 = vpop.f32.mrb[8].mxu0 }
  0xf6   : > { %648 = vst.msk [vmem:[%s959_s9 + $0xa8] sm:$0xff] %vm626_vm1, %v615_v4  ;;  %v814_v6 = vpop.f32.mrb[8].mxu1  ;;  %v565_v7 = vmul.f32 %v798_v5, %v946_v19  ;;  %v453_v9 = vpop.f32.mrb[9].mxu0 }
  0xf7   : > { %v581_v8 = vmul.f32 %v814_v6, %v946_v19  ;;  %v517_v10 = vpop.f32.mrb[9].mxu1  ;;  %v563_v11 = vmul.f32 %v946_v19, %v453_v9  ;;  %v799_v13 = vpop.f32.mrb[10].mxu0 }
  0xf8   : > { %v579_v12 = vmul.f32 %v946_v19, %v517_v10  ;;  %v815_v14 = vpop.f32.mrb[10].mxu1  ;;  %v604_v15 = vadd.f32 %v952_v21, %v565_v7  ;;  %v566_v17 = vmul.f32 %v799_v13, %v946_v19  ;;  %v456_v20 = vpop.f32.mrb[11].mxu0 }
  0xf9   : > { %v620_v16 = vadd.f32 %v952_v21, %v581_v8  ;;  %v582_v18 = vmul.f32 %v815_v14, %v946_v19  ;;  %v520_v22 = vpop.f32.mrb[11].mxu1  ;;  %v602_v23 = vadd.f32 %v952_v21, %v563_v11  ;;  %v564_v25 = vmul.f32 %v946_v19, %v456_v20 }
  0xfa   : > { %v618_v24 = vadd.f32 %v952_v21, %v579_v12  ;;  %v580_v26 = vmul.f32 %v946_v19, %v520_v22  ;;  %637 = vst.msk [vmem:[%s959_s9 + $0x50] sm:$0xff] %vm626_vm1, %v604_v15  ;;  %v605_v27 = vadd.f32 %v952_v21, %v566_v17 }
  0xfb   : > { %653 = vst.msk [vmem:[%s959_s9 + $0xd0] sm:$0xff] %vm626_vm1, %v620_v16  ;;  %v621_v28 = vadd.f32 %v952_v21, %v582_v18  ;;  %635 = vst.msk [vmem:[%s959_s9 + $0x40] sm:$0xff] %vm626_vm1, %v602_v23  ;;  %v603_v29 = vadd.f32 %v952_v21, %v564_v25 }
  0xfc   : > { %651 = vst.msk [vmem:[%s959_s9 + $0xc0] sm:$0xff] %vm626_vm1, %v618_v24  ;;  %v619_v30 = vadd.f32 %v952_v21, %v580_v26  ;;  %638 = vst.msk [vmem:[%s959_s9 + $0x58] sm:$0xff] %vm626_vm1, %v605_v27 }
  0xfd   : > { %654 = vst.msk [vmem:[%s959_s9 + $0xd8] sm:$0xff] %vm626_vm1, %v621_v28  ;;  %636 = vst.msk [vmem:[%s959_s9 + $0x48] sm:$0xff] %vm626_vm1, %v603_v29  ;;  %v802_v31 = vpop.f32.mrb[12].mxu0 }
  0xfe   : > { %652 = vst.msk [vmem:[%s959_s9 + $0xc8] sm:$0xff] %vm626_vm1, %v619_v30  ;;  %v818_v32 = vpop.f32.mrb[12].mxu1  ;;  %v569_v33 = vmul.f32 %v802_v31, %v946_v19  ;;  %v469_v35 = vpop.f32.mrb[13].mxu0 }
  0xff   : > { %v585_v34 = vmul.f32 %v818_v32, %v946_v19  ;;  %v533_v36 = vpop.f32.mrb[13].mxu1  ;;  %v567_v37 = vmul.f32 %v946_v19, %v469_v35  ;;  %v803_v39 = vpop.f32.mrb[14].mxu0 }
 0x100   : > { %v583_v38 = vmul.f32 %v946_v19, %v533_v36  ;;  %v819_v40 = vpop.f32.mrb[14].mxu1  ;;  %v608_v41 = vadd.f32 %v952_v21, %v569_v33  ;;  %v570_v43 = vmul.f32 %v803_v39, %v946_v19  ;;  %v472_v45 = vpop.f32.mrb[15].mxu0 }
 0x101   : > { %v624_v42 = vadd.f32 %v952_v21, %v585_v34  ;;  %v586_v44 = vmul.f32 %v819_v40, %v946_v19  ;;  %v536_v46 = vpop.f32.mrb[15].mxu1  ;;  %v606_v47 = vadd.f32 %v952_v21, %v567_v37  ;;  %v568_v49 = vmul.f32 %v946_v19, %v472_v45 }
 0x102   : > { %v622_v48 = vadd.f32 %v952_v21, %v583_v38  ;;  %v584_v50 = vmul.f32 %v946_v19, %v536_v46  ;;  %641 = vst.msk [vmem:[%s959_s9 + $0x70] sm:$0xff] %vm626_vm1, %v608_v41  ;;  %v609_v51 = vadd.f32 %v952_v21, %v570_v43 }
 0x103   : > { %657 = vst.msk [vmem:[%s959_s9 + $0xf0] sm:$0xff] %vm626_vm1, %v624_v42  ;;  %v625_v52 = vadd.f32 %v952_v21, %v586_v44  ;;  %639 = vst.msk [vmem:[%s959_s9 + $0x60] sm:$0xff] %vm626_vm1, %v606_v47  ;;  %v607_v53 = vadd.f32 %v952_v21, %v568_v49 }
 0x104   : > { %655 = vst.msk [vmem:[%s959_s9 + $0xe0] sm:$0xff] %vm626_vm1, %v622_v48  ;;  %v623_v54 = vadd.f32 %v952_v21, %v584_v50  ;;  %642 = vst.msk [vmem:[%s959_s9 + $0x78] sm:$0xff] %vm626_vm1, %v609_v51 }
 0x105   : > { %658 = vst.msk [vmem:[%s959_s9 + $0xf8] sm:$0xff] %vm626_vm1, %v625_v52  ;;  %640 = vst.msk [vmem:[%s959_s9 + $0x68] sm:$0xff] %vm626_vm1, %v607_v53 }
 0x106   : > { %656 = vst.msk [vmem:[%s959_s9 + $0xe8] sm:$0xff] %vm626_vm1, %v623_v54 }
 0x107 PF: > { %s14_s15 = sadd.s32 1, %s859_s15  }
 0x108   : > { %p11_p4 = scmp.ge.s32.totalorder %s14_s15, 4  }
 0x10a   :  { %13 = sbr.rel (!%p11_p4) target bundleno = 1 (0x1), region = 66 }

</bundles_post_ra>
